<compile_context>
chip_gen: v6e
topology: v6e:2x2x1
jax: 0.10.0
libtpu: 0.0.40
codegen_flags: <defaults>
</compile_context>

<pallas_src>
import functools

import jax
import jax.numpy as jnp
from jax import lax
from jax.experimental import pallas as pl
from jax.experimental.pallas import tpu as pltpu


# ----------------------------------------------------------------------------
# Layout glue: MAE patchify (matches the torch reference, NCHW input).
# ----------------------------------------------------------------------------
def patchify(imgs, p):
    """imgs: [N, C, H, W] -> [N, L, p*p*C], L = (H/p)*(W/p)."""
    N, C, H, W = imgs.shape
    h, w = H // p, W // p
    x = imgs.reshape(N, C, h, p, w, p)
    x = jnp.einsum("nchpwq->nhwpqc", x)
    return x.reshape(N, h * w, p * p * C)


# ----------------------------------------------------------------------------
# Pallas kernel.
# Each (core c, step i) processes one (TM, D) row tile and accumulates the
# masked squared error elementwise into the core's own (1, 8, D) output block.
# ----------------------------------------------------------------------------
def _target_mse_kernel(pred_ref, tgt_ref, mask_ref, out_ref, *,
                       norm_pix_loss, n_inner, tm, m_rows, needs_row_gate):
    c = pl.program_id(0)
    i = pl.program_id(1)

    @pl.when(i == 0)
    def _init():
        out_ref[...] = jnp.zeros_like(out_ref)

    t = tgt_ref[...].astype(jnp.float32)     # (TM, D)
    p = pred_ref[...].astype(jnp.float32)    # (TM, D)
    D = t.shape[-1]

    if norm_pix_loss:
        # Single pass over the target tile: per-row sum(t) and sum(t^2) are
        # the only per-row (lane) reductions in the kernel.
        sum_t = jnp.sum(t, axis=-1, keepdims=True)           # (TM, 1)
        sum_t2 = jnp.sum(t * t, axis=-1, keepdims=True)      # (TM, 1)
        mean = sum_t * (1.0 / D)
        # torch.Tensor.var() default is unbiased (divide by D - 1).
        # Identity var = (sum(t^2) - mean*sum(t)) / (D-1); clamp FP residue.
        var = jnp.maximum((sum_t2 - mean * sum_t) * (1.0 / (D - 1)), 0.0)
        t = (t - mean) * lax.rsqrt(var + 1e-6)               # EUP rsqrt

    diff = p - t
    contrib = (diff * diff) * mask_ref[...]                   # (TM, D)

    if needs_row_gate:
        # Gate rows past the true row count (overhanging last block and/or
        # the duplicated clamped overflow tile; for the latter the unclamped
        # linear tile id pushes every row id >= m_rows).  Select, not
        # multiply, so garbage/NaN in the overhang never reaches the sum.
        t_lin = c * n_inner + i
        rows = t_lin * tm + lax.broadcasted_iota(jnp.int32, (tm, 1), 0)
        contrib = jnp.where(rows < m_rows, contrib, 0.0)

    # Fold row groups with pure elementwise vreg adds (layout-preserving
    # reshape: (TM, D) -> (TM//8, 8, D)); no per-row reduction for the loss.
    out_ref[...] += jnp.sum(contrib.reshape(tm // 8, 8, D),
                            axis=0, keepdims=True)            # (1, 8, D)


# ----------------------------------------------------------------------------
# Python wrapper (mirrors TargetMSE.forward).
# ----------------------------------------------------------------------------
def target_mse(imgs, pred, mask=None, *, norm_pix_loss=True, patch_size=16,
               ignore_mask=False, max_tile_rows=None):
    """
    imgs: [N, 3, H, W]
    pred: [N, L, p*p*3] (or [N, 3, H, W], patchified here)
    mask: [N, L], 0 keep / 1 remove
    returns scalar loss (float32). NOTE: if mask.sum() == 0 the result is NaN,
    matching the torch reference (0/0).
    """
    if pred.ndim == 4:
        pred = patchify(pred, patch_size)
    target = patchify(imgs, patch_size)

    N, L, D = target.shape
    M = N * L
    # Keep native dtypes (no wrapper-side f32 up-cast pass over HBM).
    pred2 = pred.reshape(M, D)
    tgt2 = target.reshape(M, D)

    use_mask = (mask is not None) and (not ignore_mask)
    if use_mask:
        mask_flat = mask.reshape(M).astype(jnp.float32)
        den = jnp.sum(mask_flat)              # tiny reduction, done in XLA
    else:
        mask_flat = jnp.ones((M,), jnp.float32)
        den = jnp.float32(M)
    mask2 = mask_flat.reshape(M, 1)

    # Fixed large row tile (multiple of 8); no padding pass, no divisor search.
    if max_tile_rows is None:
        max_tile_rows = 1024                   # ~25 MiB peak VMEM for f32 pairs
    tm_cap = max(8, max_tile_rows - max_tile_rows % 8)
    TM = max(8, min(tm_cap, ((M + 7) // 8) * 8))

    n_tiles = pl.cdiv(M, TM)
    # Two output blocks (one per v7x TensorCore) when it pays; for small odd
    # tile counts the clamped re-read of a full tile is not worth it.
    nsplit = 2 if (n_tiles >= 2 and (n_tiles % 2 == 0 or n_tiles >= 8)) else 1
    n_inner = -(-n_tiles // nsplit)
    has_overflow = (nsplit * n_inner != n_tiles)
    needs_row_gate = (M % TM != 0) or has_overflow

    def row_block(c, i):
        t = c * n_inner + i
        if has_overflow:
            t = jnp.minimum(t, n_tiles - 1)    # clamp: never DMA a bogus block
        return (t, 0)

    kernel = functools.partial(
        _target_mse_kernel, norm_pix_loss=norm_pix_loss, n_inner=n_inner,
        tm=TM, m_rows=M, needs_row_gate=needs_row_gate)

    bytes_accessed = (pred2.size * pred2.dtype.itemsize
                      + tgt2.size * tgt2.dtype.itemsize
                      + mask2.size * 4
                      + nsplit * 8 * D * 4)
    cost = pl.CostEstimate(
        flops=M * D * (9 if norm_pix_loss else 4),
        transcendentals=(M if norm_pix_loss else 0),
        bytes_accessed=bytes_accessed)

    partials = pl.pallas_call(
        kernel,
        out_shape=jax.ShapeDtypeStruct((nsplit, 8, D), jnp.float32),
        grid_spec=pltpu.PrefetchScalarGridSpec(
            num_scalar_prefetch=0,
            grid=(nsplit, n_inner),
            in_specs=[
                pl.BlockSpec((TM, D), row_block),
                pl.BlockSpec((TM, D), row_block),
                pl.BlockSpec((TM, 1), row_block),
            ],
            out_specs=pl.BlockSpec((1, 8, D), lambda c, i: (c, 0, 0)),
        ),
        compiler_params=pltpu.CompilerParams(
            dimension_semantics=("parallel", "arbitrary"),
            vmem_limit_bytes=32 * 1024 * 1024),
        cost_estimate=cost,
    )(pred2, tgt2, mask2)

    num = jnp.sum(partials)                    # tiny (nsplit*8*D) reduce in XLA
    return num / (den * jnp.float32(D))


# ----------------------------------------------------------------------------
# Pure-JAX reference for sanity checks.
# ----------------------------------------------------------------------------
def target_mse_ref(imgs, pred, mask=None, *, norm_pix_loss=True, patch_size=16,
                   ignore_mask=False):
    if pred.ndim == 4:
        pred = patchify(pred, patch_size)
    target = patchify(imgs, patch_size).astype(jnp.float32)
    pred = pred.astype(jnp.float32)
    if norm_pix_loss:
        mean = target.mean(axis=-1, keepdims=True)
        var = target.var(axis=-1, keepdims=True, ddof=1)
        target = (target - mean) / (var + 1e-6) ** 0.5
    loss = (pred - target) ** 2
    loss = loss.mean(axis=-1)
    if mask is None or ignore_mask:
        return loss.mean()
    return (loss * mask).sum() / mask.sum()


if __name__ == "__main__":
    key = jax.random.PRNGKey(0)
    k1, k2, k3, k4, k5, k6 = jax.random.split(key, 6)

    P = 16
    Dp = P * P * 3

    # --- Test A: tiny shapes, single full-row block (M = 8) -----------------
    N, C, H, W = 2, 3, 32, 32
    L = (H // P) * (W // P)
    imgs = jax.random.normal(k1, (N, C, H, W), jnp.float32)
    pred = jax.random.normal(k2, (N, L, Dp), jnp.float32)
    mask = (jax.random.uniform(k3, (N, L)) > 0.5).astype(jnp.float32)

    out = jax.block_until_ready(target_mse(imgs, pred, mask, patch_size=P))
    ref = target_mse_ref(imgs, pred, mask, patch_size=P)
    assert abs(float(out) - float(ref)) < 1e-4, (out, ref)

    out_nm = jax.block_until_ready(target_mse(imgs, pred, None, patch_size=P))
    ref_nm = target_mse_ref(imgs, pred, None, patch_size=P)
    assert abs(float(out_nm) - float(ref_nm)) < 1e-4, (out_nm, ref_nm)

    out_im = jax.block_until_ready(
        target_mse(imgs, pred, mask, patch_size=P, ignore_mask=True))
    assert abs(float(out_im) - float(ref_nm)) < 1e-4, (out_im, ref_nm)

    # pred given as an image (4-D) instead of patches
    pred_img = jax.random.normal(k4, (N, C, H, W), jnp.float32)
    out_4d = jax.block_until_ready(target_mse(imgs, pred_img, mask, patch_size=P))
    ref_4d = target_mse_ref(imgs, pred_img, mask, patch_size=P)
    assert abs(float(out_4d) - float(ref_4d)) < 1e-4, (out_4d, ref_4d)

    # --- Test B: 2-way core split, odd tile count >= 8 (clamp + gate path) --
    N, C, H, W = 2, 3, 96, 96            # L = 36 -> M = 72; TM=8 -> 9 tiles
    L = (H // P) * (W // P)
    imgs_b = jax.random.normal(k5, (N, C, H, W), jnp.float32)
    pred_b = jax.random.normal(k6, (N, L, Dp), jnp.float32)
    mask_b = (jax.random.uniform(k3, (N, L)) > 0.5).astype(jnp.float32)

    out_b = jax.block_until_ready(
        target_mse(imgs_b, pred_b, mask_b, patch_size=P, max_tile_rows=8))
    ref_b = target_mse_ref(imgs_b, pred_b, mask_b, patch_size=P)
    assert abs(float(out_b) - float(ref_b)) < 1e-4, (out_b, ref_b)

    # --- Test C: overhanging last block (row gate) + norm_pix_loss=False ----
    N, C, H, W = 2, 3, 48, 80            # L = 15 -> M = 30; TM=16 -> 2 tiles
    L = (H // P) * (W // P)
    imgs_c = jax.random.normal(k1, (N, C, H, W), jnp.float32)
    pred_c = jax.random.normal(k2, (N, L, Dp), jnp.float32)
    mask_c = (jax.random.uniform(k4, (N, L)) > 0.5).astype(jnp.float32)

    out_c = jax.block_until_ready(
        target_mse(imgs_c, pred_c, mask_c, norm_pix_loss=False,
                   patch_size=P, max_tile_rows=16))
    ref_c = target_mse_ref(imgs_c, pred_c, mask_c, norm_pix_loss=False,
                           patch_size=P)
    assert abs(float(out_c) - float(ref_c)) < 1e-4, (out_c, ref_c)

    # --- Test D: bf16 inputs stay bf16 through HBM (kernel casts in VMEM) ---
    N, C, H, W = 2, 3, 32, 32
    L = (H // P) * (W // P)
    imgs_d = jax.random.normal(k5, (N, C, H, W), jnp.float32).astype(jnp.bfloat16)
    pred_d = jax.random.normal(k6, (N, L, Dp), jnp.float32).astype(jnp.bfloat16)
    mask_d = (jax.random.uniform(k3, (N, L)) > 0.5).astype(jnp.float32)

    out_d = jax.block_until_ready(target_mse(imgs_d, pred_d, mask_d, patch_size=P))
    ref_d = target_mse_ref(imgs_d, pred_d, mask_d, patch_size=P)
    assert abs(float(out_d) - float(ref_d)) < 1e-3, (out_d, ref_d)

    print("KERNEL_OK")
</pallas_src>

<mosaic_0001>
module attributes {stable_mosaic.version = 11 : i64} {
  func.func @_target_mse_kernel(%arg0: i32, %arg1: i32, %arg2: memref<8x768xf32, #tpu.memory_space<vmem>>, %arg3: memref<8x768xf32, #tpu.memory_space<vmem>>, %arg4: memref<8x1xf32, #tpu.memory_space<vmem>>, %arg5: memref<1x8x768xf32, #tpu.memory_space<vmem>>) attributes {dimension_semantics = [#tpu.dimension_semantics<parallel>, #tpu.dimension_semantics<arbitrary>], iteration_bounds = array<i64: 1, 1>, scalar_prefetch = 0 : i64, scratch_operands = 0 : i64, tpu.core_type = #tpu.core_type<tc>, window_params = [{transform_indices = @transform_0, window_bounds = array<i64: 8, 768>}, {transform_indices = @transform_1, window_bounds = array<i64: 8, 768>}, {transform_indices = @transform_2, window_bounds = array<i64: 8, 1>}, {transform_indices = @transform_3, window_bounds = array<i64: 1, 8, 768>}]} {
    %c0_i32 = arith.constant 0 : i32
    %0 = arith.cmpi eq, %arg1, %c0_i32 : i32
    %1 = arith.extui %0 : i1 to i32
    %c0_i32_0 = arith.constant 0 : i32
    %2 = arith.cmpi ne, %1, %c0_i32_0 : i32
    scf.if %2 {
      %cst_18 = arith.constant 0.000000e+00 : f32
      %36 = vector.broadcast %cst_18 : f32 to vector<1x8x768xf32>
      %c0_19 = arith.constant 0 : index
      %c0_20 = arith.constant 0 : index
      %c0_21 = arith.constant 0 : index
      %37 = vector.load %arg5[%c0_19, %c0_20, %c0_21] : memref<1x8x768xf32, #tpu.memory_space<vmem>>, vector<1x8x768xf32>
      tpu.vector_store %arg5[%c0_19, %c0_20, %c0_21], %36 {strides = array<i32>} : memref<1x8x768xf32, #tpu.memory_space<vmem>>, vector<1x8x768xf32>,
    } else {
    }
    %c0 = arith.constant 0 : index
    %c0_1 = arith.constant 0 : index
    %3 = vector.load %arg3[%c0, %c0_1] : memref<8x768xf32, #tpu.memory_space<vmem>>, vector<8x768xf32>
    %c0_2 = arith.constant 0 : index
    %c0_3 = arith.constant 0 : index
    %4 = vector.load %arg2[%c0_2, %c0_3] : memref<8x768xf32, #tpu.memory_space<vmem>>, vector<8x768xf32>
    %cst = arith.constant dense<0.000000e+00> : vector<8xf32>
    %5 = vector.multi_reduction <add>, %3, %cst [1] : vector<8x768xf32> to vector<8xf32>
    %6 = vector.shape_cast %5 : vector<8xf32> to vector<8x1xf32>
    %7 = arith.mulf %3, %3 : vector<8x768xf32>
    %cst_4 = arith.constant dense<0.000000e+00> : vector<8xf32>
    %8 = vector.multi_reduction <add>, %7, %cst_4 [1] : vector<8x768xf32> to vector<8xf32>
    %9 = vector.shape_cast %8 : vector<8xf32> to vector<8x1xf32>
    %cst_5 = arith.constant 0.00130208337 : f32
    %10 = vector.broadcast %cst_5 : f32 to vector<8x1xf32>
    %11 = arith.mulf %6, %10 : vector<8x1xf32>
    %12 = arith.mulf %11, %6 : vector<8x1xf32>
    %13 = arith.subf %9, %12 : vector<8x1xf32>
    %cst_6 = arith.constant 0.00130378094 : f32
    %14 = vector.broadcast %cst_6 : f32 to vector<8x1xf32>
    %15 = arith.mulf %13, %14 : vector<8x1xf32>
    %cst_7 = arith.constant 0.000000e+00 : f32
    %16 = vector.broadcast %cst_7 : f32 to vector<8x1xf32>
    %17 = arith.maximumf %15, %16 : vector<8x1xf32>
    %18 = vector.broadcast %11 : vector<8x1xf32> to vector<8x768xf32>
    %19 = arith.subf %3, %18 : vector<8x768xf32>
    %cst_8 = arith.constant 9.99999997E-7 : f32
    %20 = vector.broadcast %cst_8 : f32 to vector<8x1xf32>
    %21 = arith.addf %17, %20 : vector<8x1xf32>
    %22 = math.rsqrt %21 : vector<8x1xf32>
    %23 = vector.broadcast %22 : vector<8x1xf32> to vector<8x768xf32>
    %24 = arith.mulf %19, %23 : vector<8x768xf32>
    %25 = arith.subf %4, %24 : vector<8x768xf32>
    %26 = arith.mulf %25, %25 : vector<8x768xf32>
    %c0_9 = arith.constant 0 : index
    %c0_10 = arith.constant 0 : index
    %27 = vector.load %arg4[%c0_9, %c0_10] : memref<8x1xf32, #tpu.memory_space<vmem>>, vector<8x1xf32>
    %28 = vector.broadcast %27 : vector<8x1xf32> to vector<8x768xf32>
    %29 = arith.mulf %26, %28 : vector<8x768xf32>
    %c0_11 = arith.constant 0 : index
    %c0_12 = arith.constant 0 : index
    %c0_13 = arith.constant 0 : index
    %30 = vector.load %arg5[%c0_11, %c0_12, %c0_13] : memref<1x8x768xf32, #tpu.memory_space<vmem>>, vector<1x8x768xf32>
    %31 = vector.shape_cast %29 : vector<8x768xf32> to vector<1x8x768xf32>
    %cst_14 = arith.constant dense<0.000000e+00> : vector<8x768xf32>
    %32 = vector.multi_reduction <add>, %31, %cst_14 [0] : vector<1x8x768xf32> to vector<8x768xf32>
    %33 = vector.shape_cast %32 : vector<8x768xf32> to vector<1x8x768xf32>
    %34 = arith.addf %30, %33 : vector<1x8x768xf32>
    %c0_15 = arith.constant 0 : index
    %c0_16 = arith.constant 0 : index
    %c0_17 = arith.constant 0 : index
    %35 = vector.load %arg5[%c0_15, %c0_16, %c0_17] : memref<1x8x768xf32, #tpu.memory_space<vmem>>, vector<1x8x768xf32>
    tpu.vector_store %arg5[%c0_15, %c0_16, %c0_17], %34 {strides = array<i32>} : memref<1x8x768xf32, #tpu.memory_space<vmem>>, vector<1x8x768xf32>,
    return
  }
  func.func @transform_0(%arg0: i32, %arg1: i32) -> (i32, i32) {
    %c1_i32 = arith.constant 1 : i32
    %0 = arith.muli %arg0, %c1_i32 : i32
    %1 = arith.addi %0, %arg1 : i32
    %c0_i32 = arith.constant 0 : i32
    %c0_i32_0 = arith.constant 0 : i32
    return %1, %c0_i32 : i32, i32
  }
  func.func @transform_1(%arg0: i32, %arg1: i32) -> (i32, i32) {
    %c1_i32 = arith.constant 1 : i32
    %0 = arith.muli %arg0, %c1_i32 : i32
    %1 = arith.addi %0, %arg1 : i32
    %c0_i32 = arith.constant 0 : i32
    %c0_i32_0 = arith.constant 0 : i32
    return %1, %c0_i32 : i32, i32
  }
  func.func @transform_2(%arg0: i32, %arg1: i32) -> (i32, i32) {
    %c1_i32 = arith.constant 1 : i32
    %0 = arith.muli %arg0, %c1_i32 : i32
    %1 = arith.addi %0, %arg1 : i32
    %c0_i32 = arith.constant 0 : i32
    %c0_i32_0 = arith.constant 0 : i32
    return %1, %c0_i32 : i32, i32
  }
  func.func @transform_3(%arg0: i32, %arg1: i32) -> (i32, i32, i32) {
    %c0_i32 = arith.constant 0 : i32
    %c0_i32_0 = arith.constant 0 : i32
    %c0_i32_1 = arith.constant 0 : i32
    return %arg0, %c0_i32, %c0_i32_0 : i32, i32, i32
  }
}

</mosaic_0001>

<bundles_post_ra>
// kernel: tpu_custom_call.1
= control target key start
LH: loop header
LB: loop body
LE: loop exit
PB: predicated region body
PF: predicated region fallthrough
CT: control target
= control target key end

     0   :  { %8 = vsyncpa [#allocation3], 0  ;;  %s308_s0 = inlined_call_operand.hbm [shape: f32[8,768], index: 0, kind: input, shape index: {}]   ;;  %s309_s1 = inlined_call_operand.hbm [shape: f32[8,768], index: 1, kind: input, shape index: {}]   ;;  %s310_s2 = inlined_call_operand.vmem [shape: f32[8,1], index: 2, kind: input, shape index: {}]   ;;  %s311_s3 = inlined_call_operand.hbm [shape: f32[1,8,768], index: 3, kind: output, shape index: {}]  }
   0x1   :  { %9 = vsyncpa [#allocation6], 0 }
   0x2   :  { %10 = vsyncpa [#allocation4], 0  ;;  %s272_s12 = smov [#allocation2]   ;;  %s273_s14 = smov [#allocation5]  }
   0x3   :  { %s21_s13 = sshll.u32 %s272_s12, 4  ;;  %s35_s15 = sshll.u32 %s273_s14, 4  ;;  %s22_s13 = int_to_ptr.vmem [resolvable:$true] %s21_s13  ;;  %s36_s15 = int_to_ptr.vmem [resolvable:$true] %s35_s15 }
   0x4   :  { %s214_s16 = scalar_lea.vmem %s22_s13, 768  ;;  %p219_p1 = scmp.lt.s32.totalorder %s22_s13, %s22_s13 }
   0x5   :  { %p215_p0 = scmp.ne.s32.totalorder %s22_s13, %s214_s16  ;;  %p220_p2 = scmp.lt.s32.totalorder %s214_s16, %s214_s16 }
   0x7   :  { %p221_p3 = por %p220_p2, %p219_p1 }
   0x9   :  { %p222_p4 = pnand %p221_p3, %p215_p0 }
   0xb   :  { %225 = shalt.err (!%p222_p4)
}
   0xc   :  { %24 = dma.hbm_to_vmem [thread:$0]  %s308_s0, 768, %s22_s13, [#allocation3]  }
   0xd   :  { %s234_s19 = scalar_lea.vmem %s36_s15, 768  ;;  %p239_p6 = scmp.lt.s32.totalorder %s36_s15, %s36_s15 }
   0xe   :  { %p235_p5 = scmp.ne.s32.totalorder %s36_s15, %s234_s19  ;;  %p240_p7 = scmp.lt.s32.totalorder %s234_s19, %s234_s19 }
  0x10   :  { %p241_p8 = por %p240_p7, %p239_p6 }
  0x12   :  { %p242_p9 = pnand %p241_p8, %p235_p5 }
  0x14   :  { %245 = shalt.err (!%p242_p9)
}
  0x15   :  { %38 = dma.hbm_to_vmem [thread:$0]  %s309_s1, 768, %s36_s15, [#allocation6]  }
  0x16   :  { %266 = dma.done.wait [#allocation3], 768  }
  0x17   :  { %267 = vsyncadd [#allocation3], 4294966528 }
  0x18   :  { %268 = dma.done.wait [#allocation6], 768  }
  0x19   :  { %269 = vsyncadd [#allocation6], 4294966528  ;;  %v274_v0 = vmov 0   ;;  %v76_v1 = vld [vmem:[#allocation5] sm:$0xff]  ;;  %v77_v2 = vld [vmem:[#allocation5 + $0x8] sm:$0xff]  ;;  %s275_s1 = smov [#allocation7]  }
  0x1a   :  { %202 = vset.pattern.permute.xlu1 %v274_v0  ;;  %203 = vset.pattern.permute.xlu0 %v274_v0  ;;  %v78_v3 = vld [vmem:[#allocation5 + $0x10] sm:$0xff]  ;;  %v88_v4 = vadd.f32 %v77_v2, %v76_v1  ;;  %v95_v5 = vmul.f32 %v76_v1, %v76_v1  ;;  %v96_v6 = vmul.f32 %v77_v2, %v77_v2  ;;  %v79_v8 = vld [vmem:[#allocation5 + $0x18] sm:$0xff]  ;;  %v80_v13 = vld [vmem:[#allocation5 + $0x20] sm:$0xff] }
  0x1b   :  { %v97_v7 = vmul.f32 %v78_v3, %v78_v3  ;;  %v139_v9 = vld [vmem:[%s310_s2] sm:$0xff]  ;;  %v98_v11 = vmul.f32 %v79_v8, %v79_v8  ;;  %v99_v15 = vmul.f32 %v80_v13, %v80_v13  ;;  %v81_v17 = vld [vmem:[#allocation5 + $0x28] sm:$0xff]  ;;  %v83_v38 = vld [vmem:[#allocation2 + $0x8] sm:$0xff]  ;;  %s181_s2 = sshll.u32 %s275_s1, 4  ;;  %s182_s2 = int_to_ptr.vmem [resolvable:$true] %s181_s2 }
  0x1c   :  { %v89_v10 = vadd.f32 %v88_v4, %v78_v3  ;;  %v101_v12 = vadd.f32 %v96_v6, %v95_v5  ;;  %142 = vperm.xlu1 %202, %v139_v9   ;;  %v100_v19 = vmul.f32 %v81_v17, %v81_v17  ;;  %v82_v32 = vld [vmem:[#allocation2] sm:$0xff]  ;;  %v84_v39 = vld [vmem:[#allocation2 + $0x10] sm:$0xff]  ;;  %v85_v40 = vld [vmem:[#allocation2 + $0x18] sm:$0xff]  ;;  %s246_s23 = scalar_lea.vmem %s182_s2, 768  ;;  %p251_p11 = scmp.lt.s32.totalorder %s182_s2, %s182_s2 }
  0x1d   :  { %v86_v43 = vld [vmem:[#allocation2 + $0x20] sm:$0xff]  ;;  %v87_v44 = vld [vmem:[#allocation2 + $0x28] sm:$0xff]  ;;  %p247_p10 = scmp.ne.s32.totalorder %s182_s2, %s246_s23  ;;  %p252_p12 = scmp.lt.s32.totalorder %s246_s23, %s246_s23 }
  0x1e   :  { %v90_v14 = vadd.f32 %v89_v10, %v79_v8  ;;  %v102_v16 = vadd.f32 %v101_v12, %v97_v7 }
  0x1f   :  { %p253_p13 = por %p252_p12, %p251_p11 }
  0x20   :  { %v91_v18 = vadd.f32 %v90_v14, %v80_v13  ;;  %v103_v20 = vadd.f32 %v102_v16, %v98_v11 }
  0x21   :  { %p254_p0 = pnand %p253_p13, %p247_p10 }
  0x22   :  { %v92_v21 = vadd.f32 %v91_v18, %v81_v17  ;;  %v104_v22 = vadd.f32 %v103_v20, %v99_v15 }
  0x24   :  { %93 = vadd.xlane.f32.xlu0 %v92_v21  ;;  %v105_v23 = vadd.f32 %v104_v22, %v100_v19 }
  0x28   :  { %106 = vadd.xlane.f32.xlu0 %v105_v23 }
  0x97   :  { %v143_v55 = vpop.permute.xlu1 %142 }
  0xad   :  { %v94_v24 = vpop.xlane.xlu0 %93 }
  0xae   :  { %v108_v25 = vmul.f32 0.0013020834, %v94_v24 }
  0xb0   :  { %v109_v26 = vmul.f32 %v108_v25, %v94_v24  ;;  %v113_v33 = vsub.f32 %v76_v1, %v108_v25  ;;  %v114_v34 = vsub.f32 %v77_v2, %v108_v25  ;;  %v115_v35 = vsub.f32 %v78_v3, %v108_v25 }
  0xb1   :  { %v107_v27 = vpop.xlane.xlu0 %106  ;;  %v116_v36 = vsub.f32 %v79_v8, %v108_v25  ;;  %v117_v41 = vsub.f32 %v80_v13, %v108_v25  ;;  %v118_v42 = vsub.f32 %v81_v17, %v108_v25 }
  0xb2   :  { %v110_v28 = vsub.f32 %v107_v27, %v109_v26 }
  0xb4   :  { %v111_v29 = vmul.f32 0.0013037809, %v110_v28 }
  0xb6   :  { %v112_v30 = vmax.f32 %v111_v29, 0.0 }
  0xb8   :  { %v119_v31 = vadd.f32 1e-06, %v112_v30 }
  0xba   :  { %204 = vrsqrt.f32 %v119_v31 }
  0xc7   :  { %v205_v37 = vpop.eup %204 }
  0xc8   :  { %v121_v45 = vmul.f32 %v205_v37, %v113_v33  ;;  %v122_v46 = vmul.f32 %v205_v37, %v114_v34  ;;  %v123_v47 = vmul.f32 %v205_v37, %v115_v35  ;;  %v124_v48 = vmul.f32 %v205_v37, %v116_v36 }
  0xc9   :  { %v125_v49 = vmul.f32 %v205_v37, %v117_v41  ;;  %v126_v50 = vmul.f32 %v205_v37, %v118_v42 }
  0xca   :  { %v127_v51 = vsub.f32 %v82_v32, %v121_v45  ;;  %v128_v52 = vsub.f32 %v83_v38, %v122_v46  ;;  %v129_v53 = vsub.f32 %v84_v39, %v123_v47  ;;  %v130_v54 = vsub.f32 %v85_v40, %v124_v48 }
  0xcb   :  { %v131_v56 = vsub.f32 %v86_v43, %v125_v49  ;;  %v132_v57 = vsub.f32 %v87_v44, %v126_v50 }
  0xcc   :  { %v133_v58 = vmul.f32 %v127_v51, %v127_v51  ;;  %v134_v59 = vmul.f32 %v128_v52, %v128_v52  ;;  %v135_v60 = vmul.f32 %v129_v53, %v129_v53  ;;  %v136_v61 = vmul.f32 %v130_v54, %v130_v54 }
  0xcd   :  { %v137_v62 = vmul.f32 %v131_v56, %v131_v56  ;;  %v138_v63 = vmul.f32 %v132_v57, %v132_v57 }
  0xce   :  { %v145_v0 = vmul.f32 %v143_v55, %v133_v58  ;;  %v146_v1 = vmul.f32 %v143_v55, %v134_v59  ;;  %v147_v2 = vmul.f32 %v143_v55, %v135_v60  ;;  %v148_v3 = vmul.f32 %v143_v55, %v136_v61 }
  0xcf   :  { %v149_v4 = vmul.f32 %v143_v55, %v137_v62  ;;  %v150_v5 = vmul.f32 %v143_v55, %v138_v63 }
  0xd0   :  { %169 = vst [vmem:[#allocation7] sm:$0xff] %v145_v0  ;;  %170 = vst [vmem:[#allocation7 + $0x8] sm:$0xff] %v146_v1 }
  0xd1   :  { %171 = vst [vmem:[#allocation7 + $0x10] sm:$0xff] %v147_v2  ;;  %172 = vst [vmem:[#allocation7 + $0x18] sm:$0xff] %v148_v3 }
  0xd2   :  { %173 = vst [vmem:[#allocation7 + $0x20] sm:$0xff] %v149_v4  ;;  %174 = vst [vmem:[#allocation7 + $0x28] sm:$0xff] %v150_v5 }
  0xd3   :  { %257 = shalt.err (!%p254_p0)
}
  0xd4   :  { %184 = dma.vmem_to_hbm [thread:$0]  %s182_s2, 768, %s311_s3, [#allocation4]  }
  0xd5   :  { %270 = dma.done.wait [#allocation4], 768  }
  0xd6   :  { %271 = vsyncadd [#allocation4], 4294966528 }
  0xd7   :  { %188 = vsyncpa [#allocation3], 1 }
  0xd8   :  { %189 = vsyncpa [#allocation6], 1 }
  0xd9   :  { %190 = vsyncpa [#allocation4], 1 }

</bundles_post_ra>
